<compile_context>
chip_gen: v7x
topology: tpu7x:2x2x1
jax: 0.10.0
libtpu: 0.0.40
codegen_flags: <defaults>
</compile_context>

<pallas_src>
import functools

import jax
import jax.numpy as jnp
from jax import lax
from jax.experimental import pallas as pl
from jax.experimental.pallas import tpu as pltpu

GAMMA = 2.0
ALPHA = 0.25

_LANES = 128
_MAX_TILE_ELEMS = 512 * 1024  # 2 MiB f32 / buffer; 3 arrays x 2 bufs = 12 MiB VMEM


def _focal_loss_kernel(x_ref, t_ref, o_ref, *, gamma, alpha):
    # Upcast in-kernel: HBM traffic stays at the input dtype width.
    x = x_ref[...].astype(jnp.float32)
    t = t_ref[...].astype(jnp.float32)

    # Share one exp(-|x|) between sigmoid and the stable BCE term.
    e = jnp.exp(-jnp.abs(x))                        # 1 EUP exp / element
    inv1pe = 1.0 / (1.0 + e)
    p = jnp.where(x >= 0.0, inv1pe, e * inv1pe)     # sigmoid(x), stable

    # Numerically-stable BCEWithLogits (reduction='none'):
    #   max(x, 0) - x*t + log1p(exp(-|x|))
    ce = jnp.maximum(x, 0.0) - x * t + jnp.log1p(e)  # 1 EUP log / element

    p_t = p * t + (1.0 - p) * (1.0 - t)
    q = 1.0 - p_t
    g = float(gamma)
    if g == 2.0:
        mod = q * q                                  # avoid float-pow (exp+log)
    elif g.is_integer() and g >= 0.0:
        mod = lax.integer_pow(q, int(g))
    else:
        mod = jnp.power(jnp.maximum(q, 0.0), g)
    loss = ce * mod

    if alpha > 0:
        alpha_t = alpha * t + (1.0 - alpha) * (1.0 - t)
        loss = alpha_t * loss

    o_ref[...] = loss.astype(o_ref.dtype)


def _choose_layout(n):
    """Pick a lane-dense (rows, width) 2D view and a block row count."""
    # Widest lane-aligned width that divides n exactly (no pad), else pad to 128.
    for width in (2048, 1024, 512, 256, 128):
        if n % width == 0:
            n_pad = n
            break
    else:
        width = _LANES
        n_pad = pl.cdiv(n, _LANES) * _LANES
    rows = n_pad // width
    cap = max(8, _MAX_TILE_ELEMS // width)  # cap values are all multiples of 32
    block_rows = rows if rows <= cap else cap
    return width, n_pad, rows, block_rows


def sigmoid_focal_loss(x, target, gamma=GAMMA, alpha=ALPHA, reduction="none"):
    assert x.shape == target.shape, "input/target must be the same shape"
    orig_shape = x.shape
    out_dtype = x.dtype

    n = x.size
    width, n_pad, rows, block_rows = _choose_layout(n)

    xf = x.reshape(-1)
    tf = target.reshape(-1)
    if n_pad != n:
        # Minimal lane-alignment pad only (n not a multiple of 128).
        xf = jnp.pad(xf, (0, n_pad - n))
        tf = jnp.pad(tf, (0, n_pad - n))
    x2 = xf.reshape(rows, width)
    t2 = tf.reshape(rows, width)

    grid = (pl.cdiv(rows, block_rows),)   # partial edge block handled by Pallas
    block = (block_rows, width)
    spec = pl.BlockSpec(block, lambda i: (i, 0))

    kernel = functools.partial(_focal_loss_kernel, gamma=gamma, alpha=alpha)

    out2 = pl.pallas_call(
        kernel,
        out_shape=jax.ShapeDtypeStruct((rows, width), out_dtype),
        grid=grid,
        in_specs=[spec, spec],
        out_specs=spec,
        compiler_params=pltpu.CompilerParams(
            dimension_semantics=("parallel",),
        ),
    )(x2, t2)

    loss = out2.reshape(-1)
    if n_pad != n:
        loss = loss[:n]
    loss = loss.reshape(orig_shape)

    if reduction == "none":
        return loss
    elif reduction == "mean":
        return loss.mean()
    elif reduction == "sum":
        return loss.sum()
    else:
        raise ValueError(f"Invalid Value for arg 'reduction': '{reduction}'")


def _reference(x, t, gamma=GAMMA, alpha=ALPHA):
    """Pure-JAX reference mirroring the PyTorch module (reduction='none')."""
    x = x.astype(jnp.float32)
    t = t.astype(jnp.float32)
    p = jax.nn.sigmoid(x)
    ce = jnp.maximum(x, 0.0) - x * t + jnp.log1p(jnp.exp(-jnp.abs(x)))
    p_t = p * t + (1.0 - p) * (1.0 - t)
    loss = ce * (1.0 - p_t) ** gamma
    alpha_t = alpha * t + (1.0 - alpha) * (1.0 - t)
    return alpha_t * loss


if __name__ == "__main__":
    key = jax.random.PRNGKey(0)
    k1, k2, k3, k4 = jax.random.split(key, 4)

    # NCHW-style logits/targets (as the PyTorch module would consume).
    shape = (2, 4, 16, 16)
    logits = jax.random.normal(k1, shape, dtype=jnp.float32) * 2.0
    targets = jax.random.bernoulli(k2, p=0.3, shape=shape).astype(jnp.float32)

    loss = sigmoid_focal_loss(logits, targets, reduction="none")
    loss = jax.block_until_ready(loss)
    ref = _reference(logits, targets)
    assert loss.shape == shape
    assert jnp.allclose(loss, ref, atol=1e-5, rtol=1e-5), (
        float(jnp.max(jnp.abs(loss - ref)))
    )

    # Non-lane-aligned shape exercises the minimal-pad path.
    shape2 = (3, 5, 7)
    logits2 = jax.random.normal(k3, shape2, dtype=jnp.float32) * 2.0
    targets2 = jax.random.bernoulli(k4, p=0.5, shape=shape2).astype(jnp.float32)
    loss2 = jax.block_until_ready(sigmoid_focal_loss(logits2, targets2))
    ref2 = _reference(logits2, targets2)
    assert loss2.shape == shape2
    assert jnp.allclose(loss2, ref2, atol=1e-5, rtol=1e-5), (
        float(jnp.max(jnp.abs(loss2 - ref2)))
    )

    print("KERNEL_OK")
</pallas_src>

<mosaic_0001>
module attributes {stable_mosaic.version = 11 : i64} {
  func.func @_focal_loss_kernel(%arg0: i32, %arg1: memref<1x2048xf32, #tpu.memory_space<vmem>>, %arg2: memref<1x2048xf32, #tpu.memory_space<vmem>>, %arg3: memref<1x2048xf32, #tpu.memory_space<vmem>>) attributes {dimension_semantics = [#tpu.dimension_semantics<parallel>], iteration_bounds = array<i64: 1>, scalar_prefetch = 0 : i64, scratch_operands = 0 : i64, tpu.core_type = #tpu.core_type<tc>, window_params = [{transform_indices = @transform_0, window_bounds = array<i64: 1, 2048>}, {transform_indices = @transform_1, window_bounds = array<i64: 1, 2048>}, {transform_indices = @transform_2, window_bounds = array<i64: 1, 2048>}]} {
    %c0 = arith.constant 0 : index
    %c0_0 = arith.constant 0 : index
    %0 = vector.load %arg1[%c0, %c0_0] : memref<1x2048xf32, #tpu.memory_space<vmem>>, vector<1x2048xf32>
    %c0_1 = arith.constant 0 : index
    %c0_2 = arith.constant 0 : index
    %1 = vector.load %arg2[%c0_1, %c0_2] : memref<1x2048xf32, #tpu.memory_space<vmem>>, vector<1x2048xf32>
    %2 = math.absf %0 : vector<1x2048xf32>
    %cst = arith.constant 0.000000e+00 : f32
    %3 = vector.broadcast %cst : f32 to vector<1x2048xf32>
    %4 = arith.subf %3, %2 : vector<1x2048xf32>
    %5 = math.exp %4 : vector<1x2048xf32>
    %cst_3 = arith.constant 1.000000e+00 : f32
    %6 = vector.broadcast %cst_3 : f32 to vector<1x2048xf32>
    %7 = arith.addf %6, %5 : vector<1x2048xf32>
    %cst_4 = arith.constant 1.000000e+00 : f32
    %8 = vector.broadcast %cst_4 : f32 to vector<1x2048xf32>
    %9 = arith.divf %8, %7 : vector<1x2048xf32>
    %cst_5 = arith.constant 0.000000e+00 : f32
    %10 = vector.broadcast %cst_5 : f32 to vector<1x2048xf32>
    %11 = arith.cmpf oge, %0, %10 : vector<1x2048xf32>
    %12 = arith.mulf %5, %9 : vector<1x2048xf32>
    %13 = arith.select %11, %9, %12 : vector<1x2048xi1>, vector<1x2048xf32>
    %cst_6 = arith.constant 0.000000e+00 : f32
    %14 = vector.broadcast %cst_6 : f32 to vector<1x2048xf32>
    %15 = arith.maximumf %0, %14 : vector<1x2048xf32>
    %16 = arith.mulf %0, %1 : vector<1x2048xf32>
    %17 = arith.subf %15, %16 : vector<1x2048xf32>
    %18 = math.log1p %5 : vector<1x2048xf32>
    %19 = arith.addf %17, %18 : vector<1x2048xf32>
    %20 = arith.mulf %13, %1 : vector<1x2048xf32>
    %cst_7 = arith.constant 1.000000e+00 : f32
    %21 = vector.broadcast %cst_7 : f32 to vector<1x2048xf32>
    %22 = arith.subf %21, %13 : vector<1x2048xf32>
    %cst_8 = arith.constant 1.000000e+00 : f32
    %23 = vector.broadcast %cst_8 : f32 to vector<1x2048xf32>
    %24 = arith.subf %23, %1 : vector<1x2048xf32>
    %25 = arith.mulf %22, %24 : vector<1x2048xf32>
    %26 = arith.addf %20, %25 : vector<1x2048xf32>
    %cst_9 = arith.constant 1.000000e+00 : f32
    %27 = vector.broadcast %cst_9 : f32 to vector<1x2048xf32>
    %28 = arith.subf %27, %26 : vector<1x2048xf32>
    %29 = arith.mulf %28, %28 : vector<1x2048xf32>
    %30 = arith.mulf %19, %29 : vector<1x2048xf32>
    %cst_10 = arith.constant 2.500000e-01 : f32
    %31 = vector.broadcast %cst_10 : f32 to vector<1x2048xf32>
    %32 = arith.mulf %31, %1 : vector<1x2048xf32>
    %cst_11 = arith.constant 1.000000e+00 : f32
    %33 = vector.broadcast %cst_11 : f32 to vector<1x2048xf32>
    %34 = arith.subf %33, %1 : vector<1x2048xf32>
    %cst_12 = arith.constant 7.500000e-01 : f32
    %35 = vector.broadcast %cst_12 : f32 to vector<1x2048xf32>
    %36 = arith.mulf %35, %34 : vector<1x2048xf32>
    %37 = arith.addf %32, %36 : vector<1x2048xf32>
    %38 = arith.mulf %37, %30 : vector<1x2048xf32>
    %c0_13 = arith.constant 0 : index
    %c0_14 = arith.constant 0 : index
    %39 = vector.load %arg3[%c0_13, %c0_14] : memref<1x2048xf32, #tpu.memory_space<vmem>>, vector<1x2048xf32>
    tpu.vector_store %arg3[%c0_13, %c0_14], %38 {strides = array<i32>} : memref<1x2048xf32, #tpu.memory_space<vmem>>, vector<1x2048xf32>,
    return
  }
  func.func @transform_0(%arg0: i32) -> (i32, i32) {
    %c0_i32 = arith.constant 0 : i32
    %c0_i32_0 = arith.constant 0 : i32
    return %arg0, %c0_i32 : i32, i32
  }
  func.func @transform_1(%arg0: i32) -> (i32, i32) {
    %c0_i32 = arith.constant 0 : i32
    %c0_i32_0 = arith.constant 0 : i32
    return %arg0, %c0_i32 : i32, i32
  }
  func.func @transform_2(%arg0: i32) -> (i32, i32) {
    %c0_i32 = arith.constant 0 : i32
    %c0_i32_0 = arith.constant 0 : i32
    return %arg0, %c0_i32 : i32, i32
  }
}

</mosaic_0001>

<bundles_post_ra>
// kernel: tpu_custom_call.1
= control target key start
LH: loop header
LB: loop body
LE: loop exit
PB: predicated region body
PF: predicated region fallthrough
CT: control target
= control target key end

     0   :  { %7 = vsyncpa [#allocation3], 0  ;;  %s281_s0 = inlined_call_operand.hbm [shape: f32[1,2048], index: 0, kind: input, shape index: {}]   ;;  %s282_s1 = inlined_call_operand.hbm [shape: f32[1,2048], index: 1, kind: input, shape index: {}]   ;;  %s283_s2 = inlined_call_operand.hbm [shape: f32[1,2048], index: 2, kind: output, shape index: {}]  }
   0x1   :  { %8 = vsyncpa [#allocation6], 0 }
   0x2   :  { %9 = vsyncpa [#allocation4], 0  ;;  %s215_s9 = smov [#allocation2]   ;;  %s216_s11 = smov [#allocation5]  }
   0x3   :  { %s16_s10 = sshll.u32 %s215_s9, 4  ;;  %s26_s12 = sshll.u32 %s216_s11, 4  ;;  %s17_s10 = int_to_ptr.vmem [resolvable:$true] %s16_s10  ;;  %s27_s12 = int_to_ptr.vmem [resolvable:$true] %s26_s12 }
   0x4   :  { %s143_s15 = scalar_lea.hbm %s281_s0, 256 }
   0x5   :  { %p144_p0 = scmp.ne.s32.totalorder %s281_s0, %s143_s15  ;;  %p147_p1 = scmp.lt.u32.totalorder %s143_s15, %s281_s0 }
   0x7   :  { %p149_p2 = pnand %p147_p1, %p144_p0 }
   0x9   :  { %152 = shalt.err (!%p149_p2)
}
   0xa   :  { %s153_s20 = scalar_lea.vmem %s17_s10, 256  ;;  %p158_p4 = scmp.lt.s32.totalorder %s17_s10, %s17_s10 }
   0xb   :  { %p154_p3 = scmp.ne.s32.totalorder %s17_s10, %s153_s20  ;;  %p159_p5 = scmp.lt.s32.totalorder %s153_s20, %s153_s20 }
   0xd   :  { %p160_p6 = por %p159_p5, %p158_p4 }
   0xf   :  { %p161_p7 = pnand %p160_p6, %p154_p3 }
  0x11   :  { %164 = shalt.err (!%p161_p7)
}
  0x12   :  { %19 = dma.hbm_to_vmem [thread:$0]  %s281_s0, 256, %s17_s10, [#allocation3]  }
  0x13   :  { %s165_s25 = scalar_lea.hbm %s282_s1, 256 }
  0x14   :  { %p166_p8 = scmp.ne.s32.totalorder %s282_s1, %s165_s25  ;;  %p169_p9 = scmp.lt.u32.totalorder %s165_s25, %s282_s1 }
  0x16   :  { %p171_p10 = pnand %p169_p9, %p166_p8 }
  0x18   :  { %174 = shalt.err (!%p171_p10)
}
  0x19   :  { %s175_s30 = scalar_lea.vmem %s27_s12, 256  ;;  %p180_p12 = scmp.lt.s32.totalorder %s27_s12, %s27_s12 }
  0x1a   :  { %p176_p11 = scmp.ne.s32.totalorder %s27_s12, %s175_s30  ;;  %p181_p13 = scmp.lt.s32.totalorder %s175_s30, %s175_s30 }
  0x1c   :  { %p182_p0 = por %p181_p13, %p180_p12 }
  0x1e   :  { %p183_p1 = pnand %p182_p0, %p176_p11 }
  0x20   :  { %186 = shalt.err (!%p183_p1)
}
  0x21   :  { %29 = dma.hbm_to_vmem [thread:$0]  %s282_s1, 256, %s27_s12, [#allocation6]  }
  0x22   :  { %209 = dma.done.wait [#allocation3], 256  }
  0x23   :  { %210 = vsyncadd [#allocation3], 4294967040 }
  0x24   :  { %211 = dma.done.wait [#allocation6], 256  }
  0x25   :  { %212 = vsyncadd [#allocation6], 4294967040  ;;  %v36_v0 = vld [vmem:[#allocation2] sm:$0xff]  ;;  %v37_v1 = vld [vmem:[#allocation2 + $0x8] sm:$0xff]  ;;  %s217_s1 = smov [#allocation7]  }
  0x26   :  { %v40_v2 = vand.u32 2147483647, %v36_v0  ;;  %v41_v3 = vand.u32 2147483647, %v37_v1  ;;  %v38_v14 = vld [vmem:[#allocation5] sm:$0xff]  ;;  %vm54_vm0 = vcmp.ge.f32.partialorder %v36_v0, 0.0 }
  0x27   :  { %v60_v17 = vmax.f32 %v36_v0, 0.0  ;;  %v62_v21 = vmul.f32 %v38_v14, %v36_v0  ;;  %v90_v22 = vsub.f32 1.0, %v38_v14  ;;  %v39_v23 = vld [vmem:[#allocation5 + $0x8] sm:$0xff]  ;;  %vm55_vm1 = vcmp.ge.f32.partialorder %v37_v1, 0.0  ;;  %s118_s4 = sshll.u32 %s217_s1, 4  ;;  %s119_s4 = int_to_ptr.vmem [resolvable:$true] %s118_s4 }
  0x28   :  { %v42_v4 = vsub.f32 0.0, %v40_v2  ;;  %v43_v5 = vsub.f32 0.0, %v41_v3  ;;  %v61_v26 = vmax.f32 %v37_v1, 0.0  ;;  %v63_v27 = vmul.f32 %v39_v23, %v37_v1  ;;  %s187_s5 = scalar_lea.vmem %s119_s4, 256  ;;  %p192_p3 = scmp.lt.s32.totalorder %s119_s4, %s119_s4 }
  0x29   :  { %v91_v37 = vsub.f32 1.0, %v39_v23  ;;  %v64_v38 = vsub.f32 %v60_v17, %v62_v21  ;;  %v102_v47 = vmul.f32 0.25, %v38_v14  ;;  %v104_v49 = vmul.f32 0.75, %v90_v22  ;;  %p188_p2 = scmp.ne.s32.totalorder %s119_s4, %s187_s5  ;;  %p193_p4 = scmp.lt.s32.totalorder %s187_s5, %s187_s5 }
  0x2a   :  { %v44_v6 = vmul.f32 1.442695, %v42_v4  ;;  %v46_v7 = vmul.f32 1.442695, %v43_v5  ;;  %v65_v50 = vsub.f32 %v61_v26, %v63_v27  ;;  %v103_v53 = vmul.f32 0.25, %v39_v23 }
  0x2b   :  { %v105_v57 = vmul.f32 0.75, %v91_v37  ;;  %v106_v59 = vadd.f32 %v104_v49, %v102_v47  ;;  %p194_p5 = por %p193_p4, %p192_p3 }
  0x2c   :  { %131 = vpow2.f32 %v44_v6 }
  0x2d   :  { %133 = vpow2.f32 %v46_v7  ;;  %v107_v0 = vadd.f32 %v105_v57, %v103_v53  ;;  %p195_p6 = pnand %p194_p5, %p188_p2 }
  0x36   :  { %v132_v8 = vpop.eup %131 }
  0x37   :  { %v134_v9 = vpop.eup %133  ;;  %v48_v10 = vadd.f32 1.0, %v132_v8  ;;  %v69_v12 = vmul.f32 -0.5, %v132_v8  ;;  %v72_v18 = vand.u32 2147483647, %v132_v8 }
  0x38   :  { %v49_v11 = vadd.f32 1.0, %v134_v9  ;;  %v78_v13 = vmul.f32 -0.5, %v134_v9  ;;  %v81_v28 = vand.u32 2147483647, %v134_v9 }
  0x39   :  { %135 = vrcp.f32 %v48_v10  ;;  %v70_v15 = vadd.f32 1.0, %v69_v12  ;;  %vm257_vm2 = vcmp.lt.f32.partialorder %v72_v18, 0.0004427343 }
  0x3a   :  { %137 = vlog2.f32 %v48_v10  ;;  %v79_v24 = vadd.f32 1.0, %v78_v13  ;;  %vm261_vm3 = vcmp.lt.f32.partialorder %v81_v28, 0.0004427343 }
  0x3b   :  { %139 = vrcp.f32 %v49_v11  ;;  %v71_v32 = vmul.f32 %v132_v8, %v70_v15 }
  0x3c   :  { %141 = vlog2.f32 %v49_v11  ;;  %v80_v41 = vmul.f32 %v134_v9, %v79_v24 }
  0x43   :  { %v136_v16 = vpop.eup %135 }
  0x44   :  { %v138_v19 = vpop.eup %137  ;;  %v56_v20 = vmul.f32 %v136_v16, %v132_v8 }
  0x45   :  { %v140_v25 = vpop.eup %139  ;;  %v68_v31 = vmul.f32 0.6931472, %v138_v19 }
  0x46   :  { %v142_v29 = vpop.eup %141  ;;  %v58_v30 = vsel %vm54_vm0, %v136_v16, %v56_v20  ;;  %v57_v33 = vmul.f32 %v140_v25, %v134_v9 }
  0x47   :  { %v86_v35 = vmul.f32 %v58_v30, %v38_v14  ;;  %v88_v36 = vsub.f32 1.0, %v58_v30  ;;  %v77_v40 = vmul.f32 0.6931472, %v142_v29  ;;  %v74_v46 = vsel %vm257_vm2, %v71_v32, %v68_v31 }
  0x48   :  { %v59_v39 = vsel %vm55_vm1, %v140_v25, %v57_v33  ;;  %v84_v54 = vadd.f32 %v74_v46, %v64_v38 }
  0x49   :  { %v92_v42 = vmul.f32 %v90_v22, %v88_v36  ;;  %v87_v44 = vmul.f32 %v59_v39, %v39_v23  ;;  %v89_v45 = vsub.f32 1.0, %v59_v39  ;;  %v83_v52 = vsel %vm261_vm3, %v80_v41, %v77_v40 }
  0x4a   :  { %v85_v60 = vadd.f32 %v83_v52, %v65_v50 }
  0x4b   :  { %v94_v48 = vadd.f32 %v92_v42, %v86_v35  ;;  %v93_v51 = vmul.f32 %v91_v37, %v89_v45 }
  0x4d   :  { %v96_v55 = vsub.f32 1.0, %v94_v48  ;;  %v95_v56 = vadd.f32 %v93_v51, %v87_v44 }
  0x4f   :  { %v98_v58 = vmul.f32 %v96_v55, %v96_v55  ;;  %v97_v61 = vsub.f32 1.0, %v95_v56 }
  0x51   :  { %v100_v62 = vmul.f32 %v98_v58, %v84_v54  ;;  %v99_v63 = vmul.f32 %v97_v61, %v97_v61 }
  0x53   :  { %v108_v1 = vmul.f32 %v106_v59, %v100_v62  ;;  %v101_v2 = vmul.f32 %v99_v63, %v85_v60 }
  0x55   :  { %110 = vst [vmem:[#allocation7] sm:$0xff] %v108_v1  ;;  %v109_v3 = vmul.f32 %v107_v0, %v101_v2 }
  0x57   :  { %111 = vst [vmem:[#allocation7 + $0x8] sm:$0xff] %v109_v3 }
  0x58   :  { %198 = shalt.err (!%p195_p6)
}
  0x59   :  { %s199_s8 = scalar_lea.hbm %s283_s2, 256 }
  0x5a   :  { %p200_p7 = scmp.ne.s32.totalorder %s283_s2, %s199_s8  ;;  %p203_p8 = scmp.lt.u32.totalorder %s199_s8, %s283_s2 }
  0x5c   :  { %p205_p9 = pnand %p203_p8, %p200_p7 }
  0x5e   :  { %208 = shalt.err (!%p205_p9)
}
  0x5f   :  { %121 = dma.vmem_to_hbm [thread:$0]  %s119_s4, 256, %s283_s2, [#allocation4]  }
  0x60   :  { %213 = dma.done.wait [#allocation4], 256  }
  0x61   :  { %214 = vsyncadd [#allocation4], 4294967040 }
  0x62   :  { %125 = vsyncpa [#allocation3], 1 }
  0x63   :  { %126 = vsyncpa [#allocation6], 1 }
  0x64   :  { %127 = vsyncpa [#allocation4], 1 }

</bundles_post_ra>
